<compile_context>
chip_gen: v7x
topology: tpu7x:2x2x1
jax: 0.10.0
libtpu: 0.0.40
codegen_flags: <defaults>
</compile_context>

<pallas_src>
import functools

import jax
import jax.numpy as jnp
from jax.experimental import pallas as pl
from jax.experimental.pallas import tpu as pltpu

LANE = 128             # hidden AND output feature dims padded lane-dense
MAX_BATCH_TILE = 4096  # rows per grid step at large batch


def _softplus(x):
    """f32 softplus matching torch.nn.functional.softplus (beta=1, threshold=20)."""
    return jnp.where(x > 20.0, x, jnp.log1p(jnp.exp(jnp.minimum(x, 20.0))))


def _round_up(n, m):
    return ((n + m - 1) // m) * m


def _choose_tiling(B):
    """Pick (TB, n_tiles): TB % 8 == 0, batch padding stays within one tile,
    and the grid has >= 2 (even) steps once B > 8 so the "parallel" grid axis
    can shard across v7x's two TensorCores (harmless on 1-TC v5e/v6e)."""
    if B <= 8:
        return _round_up(max(B, 1), 8), 1
    n_tiles = max(2, pl.cdiv(B, MAX_BATCH_TILE))
    if n_tiles % 2:
        n_tiles += 1                         # even tile count -> balanced TC split
    TB = _round_up(pl.cdiv(B, n_tiles), 8)
    n_tiles = pl.cdiv(B, TB)
    return TB, n_tiles


def _monotonic_mlp_kernel(*refs, n_layers):
    """Whole MonotonicMLP forward on one (TB, D_in) batch tile.

    refs = [x, w0, b0, w1, b1, ..., out]. Weights arrive already "effective"
    (|W| and the layer-0 sign t folded in by the wrapper), pre-transposed to
    (in, out) and zero-padded lane-dense; padded lanes stay inert.
    """
    x_ref = refs[0]
    wb = refs[1:1 + 2 * n_layers]
    o_ref = refs[-1]

    h = x_ref[...].astype(jnp.float32)                 # (TB, D_in)

    # ---- Layer 0: D_in = len(t) is tiny, so use exact f32 VPU MACs instead
    #      of a K=1/2 MXU pass; wide inputs fall back to the MXU.
    w0 = wb[0][...]                                    # (D_in, H1p)
    b0 = wb[1][...]                                    # (1, H1p) broadcasts over batch
    d_in = h.shape[-1]
    if d_in < 8:
        acc = b0
        for j in range(d_in):
            acc = acc + h[:, j:j + 1] * w0[j:j + 1, :]
        h = acc
    else:
        h = jnp.dot(h, w0, preferred_element_type=jnp.float32) + b0
    if n_layers > 1:
        h = _softplus(h)

    # ---- Layers 1..L-1: MXU matmul (+ softplus except on the last layer) ----
    for layer in range(1, n_layers):
        w = wb[2 * layer][...]                         # (H_prev_p, H_next_p)
        b = wb[2 * layer + 1][...]                     # (1, H_next_p)
        h = jnp.dot(h, w, preferred_element_type=jnp.float32) + b
        if layer < n_layers - 1:
            h = _softplus(h)

    o_ref[...] = h.astype(o_ref.dtype)                 # lane-dense store


def prepare_effective_params(params, t, lane=LANE):
    """Fold |W| (and the layer-0 per-input-feature sign t) into the weights
    once, pre-transpose to (in, out), and zero-pad feature dims lane-dense.

    Zero padding is exact: padded activation lanes (softplus(0) after the
    activation) meet all-zero weight rows in the next layer and contribute
    nothing; padded output columns carry zero bias and are sliced off."""
    t = jnp.asarray(t, jnp.float32)
    eff = []
    for i, (w, b) in enumerate(params):
        w_eff = jnp.abs(w) * t if i == 0 else jnp.abs(w)    # (out, in) * (in,)
        w_t = w_eff.T                                        # (in, out)
        in_p = w_t.shape[0] if i == 0 else _round_up(w_t.shape[0], lane)
        out_p = _round_up(w_t.shape[1], lane)                # last layer padded too
        w_t = jnp.pad(w_t, ((0, in_p - w_t.shape[0]),
                            (0, out_p - w_t.shape[1])))
        b2 = jnp.pad(b, (0, out_p - b.shape[0])).reshape(1, out_p)
        eff.append((w_t.astype(jnp.float32), b2.astype(jnp.float32)))
    return eff


def monotonic_mlp_forward(x_list, eff_params, d_out):
    """y = MonotonicMLP(x_list) as one fused pallas_call over a batch grid."""
    # In-wrapper "concat": a trivial copy of a few narrow columns; gives the
    # kernel one lane-packed (TB, D_in) block instead of n_x tiny DMAs/tile.
    x = x_list[0] if len(x_list) == 1 else jnp.concatenate(x_list, axis=-1)
    x = x.astype(jnp.float32)
    B, d_in = x.shape
    n_layers = len(eff_params)
    d_out_pad = int(eff_params[-1][0].shape[-1])

    TB, n_tiles = _choose_tiling(B)
    B_pad = TB * n_tiles
    if B_pad != B:
        x = jnp.pad(x, ((0, B_pad - B), (0, 0)))

    inputs = [x]
    in_specs = [pl.BlockSpec((TB, d_in), lambda i: (i, 0))]
    for w_t, b2 in eff_params:                  # grid-invariant, VMEM-resident
        inputs.append(w_t)
        in_specs.append(pl.BlockSpec(w_t.shape, lambda i: (0, 0)))
        inputs.append(b2)
        in_specs.append(pl.BlockSpec(b2.shape, lambda i: (0, 0)))

    kernel = functools.partial(_monotonic_mlp_kernel, n_layers=n_layers)

    flops = 2 * B_pad * sum(int(w.shape[0]) * int(w.shape[1])
                            for w, _ in eff_params)
    transcendentals = 2 * B_pad * sum(int(w.shape[1]) for w, _ in eff_params[:-1])
    bytes_accessed = int(sum(a.size * a.dtype.itemsize for a in inputs)
                         + B_pad * d_out_pad * 4)

    out = pl.pallas_call(
        kernel,
        out_shape=jax.ShapeDtypeStruct((B_pad, d_out_pad), jnp.float32),
        grid=(n_tiles,),
        in_specs=in_specs,
        out_specs=pl.BlockSpec((TB, d_out_pad), lambda i: (i, 0)),
        compiler_params=pltpu.CompilerParams(
            dimension_semantics=("parallel",)),
        cost_estimate=pl.CostEstimate(flops=int(flops),
                                      transcendentals=int(transcendentals),
                                      bytes_accessed=bytes_accessed),
    )(*inputs)
    return out[:B, :d_out]


def init_mlp_params(layer_vec, key):
    """Raw (weight, bias) per layer, same shapes/init scale as nn.Linear."""
    params = []
    for k in range(len(layer_vec) - 1):
        fan_in, fan_out = layer_vec[k], layer_vec[k + 1]
        key, kw, kb = jax.random.split(key, 3)
        bound = 1.0 / (fan_in ** 0.5)
        w = jax.random.uniform(kw, (fan_out, fan_in), jnp.float32,
                               minval=-bound, maxval=bound)
        b = jax.random.uniform(kb, (fan_out,), jnp.float32,
                               minval=-bound, maxval=bound)
        params.append((w, b))
    return params


def _reference_forward(x_list, raw_params, t):
    """Pure-JAX reference of the exact module math (unpadded weights)."""
    x = jnp.concatenate(x_list, axis=-1) if len(x_list) > 1 else x_list[0]
    for i, (w, b) in enumerate(raw_params):
        weight = jnp.abs(w) * t if i == 0 else jnp.abs(w)    # (out, in) * (in,)
        prec = jax.lax.Precision.HIGHEST if i == 0 else None
        x = jnp.dot(x, weight.T, precision=prec) + b
        if i < len(raw_params) - 1:
            x = _softplus(x)
    return x


if __name__ == "__main__":
    key = jax.random.PRNGKey(0)

    # Default MonotonicMLP buffer t=[1, -1]; |W0| * t broadcasts over the
    # input-feature dim, so the concatenated input width must equal len(t)=2.
    t = jnp.asarray([1.0, -1.0], jnp.float32)
    layer_vec = [2, 64, 48, 16]

    kp, k1, k2 = jax.random.split(key, 3)
    raw_params = init_mlp_params(layer_vec, kp)
    eff_params = prepare_effective_params(raw_params, t)

    # --- small-batch run (single grid step) ---
    batch = 8
    x_list = [jax.random.normal(k1, (batch, 1), jnp.float32),
              jax.random.normal(k2, (batch, 1), jnp.float32)]
    out = monotonic_mlp_forward(x_list, eff_params, d_out=layer_vec[-1])
    jax.block_until_ready(out)
    assert out.shape == (batch, layer_vec[-1])
    ref = _reference_forward(x_list, raw_params, t)
    err = float(jnp.max(jnp.abs(out - ref)))
    assert jnp.allclose(out, ref, atol=1e-3, rtol=1e-3), f"max |err| = {err}"

    # --- multi-tile run (exercises batch padding + 2-step parallel grid) ---
    batch2 = 300
    k3, k4 = jax.random.split(kp)
    x_list2 = [jax.random.normal(k3, (batch2, 1), jnp.float32),
               jax.random.normal(k4, (batch2, 1), jnp.float32)]
    out2 = monotonic_mlp_forward(x_list2, eff_params, d_out=layer_vec[-1])
    jax.block_until_ready(out2)
    assert out2.shape == (batch2, layer_vec[-1])
    ref2 = _reference_forward(x_list2, raw_params, t)
    err2 = float(jnp.max(jnp.abs(out2 - ref2)))
    assert jnp.allclose(out2, ref2, atol=1e-3, rtol=1e-3), f"max |err| = {err2}"

    print("KERNEL_OK")
</pallas_src>

<mosaic_0001>
module attributes {stable_mosaic.version = 11 : i64} {
  func.func @_monotonic_mlp_kernel(%arg0: i32, %arg1: memref<8x2xf32, #tpu.memory_space<vmem>>, %arg2: memref<2x128xf32, #tpu.memory_space<vmem>>, %arg3: memref<1x128xf32, #tpu.memory_space<vmem>>, %arg4: memref<128x128xf32, #tpu.memory_space<vmem>>, %arg5: memref<1x128xf32, #tpu.memory_space<vmem>>, %arg6: memref<128x128xf32, #tpu.memory_space<vmem>>, %arg7: memref<1x128xf32, #tpu.memory_space<vmem>>, %arg8: memref<8x128xf32, #tpu.memory_space<vmem>>) attributes {dimension_semantics = [#tpu.dimension_semantics<parallel>], iteration_bounds = array<i64: 1>, scalar_prefetch = 0 : i64, scratch_operands = 0 : i64, tpu.core_type = #tpu.core_type<tc>, window_params = [{transform_indices = @transform_0, window_bounds = array<i64: 8, 2>}, {pipeline_mode = #tpu.pipeline_mode<synchronous>, transform_indices = @transform_1, window_bounds = array<i64: 2, 128>}, {pipeline_mode = #tpu.pipeline_mode<synchronous>, transform_indices = @transform_2, window_bounds = array<i64: 1, 128>}, {pipeline_mode = #tpu.pipeline_mode<synchronous>, transform_indices = @transform_3, window_bounds = array<i64: 128, 128>}, {pipeline_mode = #tpu.pipeline_mode<synchronous>, transform_indices = @transform_4, window_bounds = array<i64: 1, 128>}, {pipeline_mode = #tpu.pipeline_mode<synchronous>, transform_indices = @transform_5, window_bounds = array<i64: 128, 128>}, {pipeline_mode = #tpu.pipeline_mode<synchronous>, transform_indices = @transform_6, window_bounds = array<i64: 1, 128>}, {transform_indices = @transform_7, window_bounds = array<i64: 8, 128>}]} {
    %c0 = arith.constant 0 : index
    %c0_0 = arith.constant 0 : index
    %0 = vector.load %arg1[%c0, %c0_0] : memref<8x2xf32, #tpu.memory_space<vmem>>, vector<8x2xf32>
    %c0_1 = arith.constant 0 : index
    %c0_2 = arith.constant 0 : index
    %1 = vector.load %arg2[%c0_1, %c0_2] : memref<2x128xf32, #tpu.memory_space<vmem>>, vector<2x128xf32>
    %c0_3 = arith.constant 0 : index
    %c0_4 = arith.constant 0 : index
    %2 = vector.load %arg3[%c0_3, %c0_4] : memref<1x128xf32, #tpu.memory_space<vmem>>, vector<1x128xf32>
    %3 = vector.extract_strided_slice %0 {offsets = [0, 0], sizes = [8, 1], strides = [1, 1]} : vector<8x2xf32> to vector<8x1xf32>
    %4 = vector.extract_strided_slice %1 {offsets = [0, 0], sizes = [1, 128], strides = [1, 1]} : vector<2x128xf32> to vector<1x128xf32>
    %5 = vector.broadcast %3 : vector<8x1xf32> to vector<8x128xf32>
    %6 = vector.broadcast %4 : vector<1x128xf32> to vector<8x128xf32>
    %7 = arith.mulf %5, %6 : vector<8x128xf32>
    %8 = vector.broadcast %2 : vector<1x128xf32> to vector<8x128xf32>
    %9 = arith.addf %8, %7 : vector<8x128xf32>
    %10 = vector.extract_strided_slice %0 {offsets = [0, 1], sizes = [8, 1], strides = [1, 1]} : vector<8x2xf32> to vector<8x1xf32>
    %11 = vector.extract_strided_slice %1 {offsets = [1, 0], sizes = [1, 128], strides = [1, 1]} : vector<2x128xf32> to vector<1x128xf32>
    %12 = vector.broadcast %10 : vector<8x1xf32> to vector<8x128xf32>
    %13 = vector.broadcast %11 : vector<1x128xf32> to vector<8x128xf32>
    %14 = arith.mulf %12, %13 : vector<8x128xf32>
    %15 = arith.addf %9, %14 : vector<8x128xf32>
    %cst = arith.constant 2.000000e+01 : f32
    %16 = vector.broadcast %cst : f32 to vector<8x128xf32>
    %17 = arith.cmpf ogt, %15, %16 : vector<8x128xf32>
    %cst_5 = arith.constant 2.000000e+01 : f32
    %18 = vector.broadcast %cst_5 : f32 to vector<8x128xf32>
    %19 = arith.minimumf %15, %18 : vector<8x128xf32>
    %20 = math.exp %19 : vector<8x128xf32>
    %21 = math.log1p %20 : vector<8x128xf32>
    %22 = arith.select %17, %15, %21 : vector<8x128xi1>, vector<8x128xf32>
    %c0_6 = arith.constant 0 : index
    %c0_7 = arith.constant 0 : index
    %23 = vector.load %arg4[%c0_6, %c0_7] : memref<128x128xf32, #tpu.memory_space<vmem>>, vector<128x128xf32>
    %c0_8 = arith.constant 0 : index
    %c0_9 = arith.constant 0 : index
    %24 = vector.load %arg5[%c0_8, %c0_9] : memref<1x128xf32, #tpu.memory_space<vmem>>, vector<1x128xf32>
    %cst_10 = arith.constant dense<0.000000e+00> : vector<8x128xf32>
    %25 = tpu.matmul %22, %23, %cst_10 {dimension_numbers = #tpu.dot_dimension_numbers<[1], [0], [0], [1], [0, 0, 1, 1], [], []>} : vector<8x128xf32>, vector<128x128xf32>, vector<8x128xf32> -> vector<8x128xf32>
    %26 = vector.broadcast %24 : vector<1x128xf32> to vector<8x128xf32>
    %27 = arith.addf %25, %26 : vector<8x128xf32>
    %cst_11 = arith.constant 2.000000e+01 : f32
    %28 = vector.broadcast %cst_11 : f32 to vector<8x128xf32>
    %29 = arith.cmpf ogt, %27, %28 : vector<8x128xf32>
    %cst_12 = arith.constant 2.000000e+01 : f32
    %30 = vector.broadcast %cst_12 : f32 to vector<8x128xf32>
    %31 = arith.minimumf %27, %30 : vector<8x128xf32>
    %32 = math.exp %31 : vector<8x128xf32>
    %33 = math.log1p %32 : vector<8x128xf32>
    %34 = arith.select %29, %27, %33 : vector<8x128xi1>, vector<8x128xf32>
    %c0_13 = arith.constant 0 : index
    %c0_14 = arith.constant 0 : index
    %35 = vector.load %arg6[%c0_13, %c0_14] : memref<128x128xf32, #tpu.memory_space<vmem>>, vector<128x128xf32>
    %c0_15 = arith.constant 0 : index
    %c0_16 = arith.constant 0 : index
    %36 = vector.load %arg7[%c0_15, %c0_16] : memref<1x128xf32, #tpu.memory_space<vmem>>, vector<1x128xf32>
    %cst_17 = arith.constant dense<0.000000e+00> : vector<8x128xf32>
    %37 = tpu.matmul %34, %35, %cst_17 {dimension_numbers = #tpu.dot_dimension_numbers<[1], [0], [0], [1], [0, 0, 1, 1], [], []>} : vector<8x128xf32>, vector<128x128xf32>, vector<8x128xf32> -> vector<8x128xf32>
    %38 = vector.broadcast %36 : vector<1x128xf32> to vector<8x128xf32>
    %39 = arith.addf %37, %38 : vector<8x128xf32>
    %c0_18 = arith.constant 0 : index
    %c0_19 = arith.constant 0 : index
    %40 = vector.load %arg8[%c0_18, %c0_19] : memref<8x128xf32, #tpu.memory_space<vmem>>, vector<8x128xf32>
    tpu.vector_store %arg8[%c0_18, %c0_19], %39 {strides = array<i32>} : memref<8x128xf32, #tpu.memory_space<vmem>>, vector<8x128xf32>,
    return
  }
  func.func @transform_0(%arg0: i32) -> (i32, i32) {
    %c0_i32 = arith.constant 0 : i32
    %c0_i32_0 = arith.constant 0 : i32
    return %arg0, %c0_i32 : i32, i32
  }
  func.func @transform_1(%arg0: i32) -> (i32, i32) {
    %c0_i32 = arith.constant 0 : i32
    %c0_i32_0 = arith.constant 0 : i32
    %c0_i32_1 = arith.constant 0 : i32
    return %c0_i32, %c0_i32_0 : i32, i32
  }
  func.func @transform_2(%arg0: i32) -> (i32, i32) {
    %c0_i32 = arith.constant 0 : i32
    %c0_i32_0 = arith.constant 0 : i32
    %c0_i32_1 = arith.constant 0 : i32
    return %c0_i32, %c0_i32_0 : i32, i32
  }
  func.func @transform_3(%arg0: i32) -> (i32, i32) {
    %c0_i32 = arith.constant 0 : i32
    %c0_i32_0 = arith.constant 0 : i32
    %c0_i32_1 = arith.constant 0 : i32
    return %c0_i32, %c0_i32_0 : i32, i32
  }
  func.func @transform_4(%arg0: i32) -> (i32, i32) {
    %c0_i32 = arith.constant 0 : i32
    %c0_i32_0 = arith.constant 0 : i32
    %c0_i32_1 = arith.constant 0 : i32
    return %c0_i32, %c0_i32_0 : i32, i32
  }
  func.func @transform_5(%arg0: i32) -> (i32, i32) {
    %c0_i32 = arith.constant 0 : i32
    %c0_i32_0 = arith.constant 0 : i32
    %c0_i32_1 = arith.constant 0 : i32
    return %c0_i32, %c0_i32_0 : i32, i32
  }
  func.func @transform_6(%arg0: i32) -> (i32, i32) {
    %c0_i32 = arith.constant 0 : i32
    %c0_i32_0 = arith.constant 0 : i32
    %c0_i32_1 = arith.constant 0 : i32
    return %c0_i32, %c0_i32_0 : i32, i32
  }
  func.func @transform_7(%arg0: i32) -> (i32, i32) {
    %c0_i32 = arith.constant 0 : i32
    %c0_i32_0 = arith.constant 0 : i32
    return %arg0, %c0_i32 : i32, i32
  }
}

</mosaic_0001>

<bundles_post_ra>
// kernel: tpu_custom_call.1
= control target key start
LH: loop header
LB: loop body
LE: loop exit
PB: predicated region body
PF: predicated region fallthrough
CT: control target
= control target key end

     0   :  { %12 = vsyncpa [#allocation3], 0  ;;  %s680_s0 = inlined_call_operand.vmem [shape: f32[8,2], index: 0, kind: input, shape index: {}]   ;;  %s681_s1 = inlined_call_operand.vmem [shape: f32[2,128], index: 1, kind: input, shape index: {}]   ;;  %s682_s2 = inlined_call_operand.vmem [shape: f32[1,128], index: 2, kind: input, shape index: {}]   ;;  %s683_s3 = inlined_call_operand.hbm [shape: f32[128,128], index: 3, kind: input, shape index: {}]   ;;  %s684_s4 = inlined_call_operand.vmem [shape: f32[1,128], index: 4, kind: input, shape index: {}]   ;;  %s685_s5 = inlined_call_operand.hbm [shape: f32[128,128], index: 5, kind: input, shape index: {}]   ;;  %s686_s6 = inlined_call_operand.vmem [shape: f32[1,128], index: 6, kind: input, shape index: {}]   ;;  %s687_s7 = inlined_call_operand.hbm [shape: f32[8,128], index: 7, kind: output, shape index: {}]  }
   0x1   :  { %13 = vsyncpa [#allocation6], 0 }
   0x2   :  { %14 = vsyncpa [#allocation4], 0  ;;  %s563_s24 = smov [#allocation2]   ;;  %s491_s28 = scalar_lea.hbm %s683_s3, 2048 }
   0x3   :  { %s26_s25 = sshll.u32 %s563_s24, 4  ;;  %p492_p0 = scmp.ne.s32.totalorder %s683_s3, %s491_s28  ;;  %s27_s25 = int_to_ptr.vmem [resolvable:$true] %s26_s25 }
   0x4   :  { %p495_p1 = scmp.lt.u32.totalorder %s491_s28, %s683_s3 }
   0x6   :  { %p497_p2 = pnand %p495_p1, %p492_p0 }
   0x8   :  { %500 = shalt.err (!%p497_p2)
}
   0x9   :  { %s501_s10 = scalar_lea.vmem %s27_s25, 2048  ;;  %p506_p4 = scmp.lt.s32.totalorder %s27_s25, %s27_s25 }
   0xa   :  { %p502_p3 = scmp.ne.s32.totalorder %s27_s25, %s501_s10  ;;  %p507_p5 = scmp.lt.s32.totalorder %s501_s10, %s501_s10 }
   0xc   :  { %p508_p6 = por %p507_p5, %p506_p4 }
   0xe   :  { %p509_p7 = pnand %p508_p6, %p502_p3 }
  0x10   :  { %512 = shalt.err (!%p509_p7)
}
  0x11   :  { %s564_s11 = smov 128   ;;  %s565_s12 = smov 8  }
  0x12   :  { %32 = dma.hbm_to_vmem [thread:$0]  %s683_s3, 2048, %s27_s25, [#allocation3], %s564_s11, %s564_s11, %s565_s12  }
  0x13   :  { %s566_s15 = smov [#allocation5]   ;;  %s513_s19 = scalar_lea.hbm %s685_s5, 2048 }
  0x14   :  { %s40_s16 = sshll.u32 %s566_s15, 4  ;;  %p514_p8 = scmp.ne.s32.totalorder %s685_s5, %s513_s19  ;;  %s41_s16 = int_to_ptr.vmem [resolvable:$true] %s40_s16 }
  0x15   :  { %p517_p9 = scmp.lt.u32.totalorder %s513_s19, %s685_s5 }
  0x17   :  { %p519_p10 = pnand %p517_p9, %p514_p8 }
  0x19   :  { %522 = shalt.err (!%p519_p10)
}
  0x1a   :  { %s523_s24 = scalar_lea.vmem %s41_s16, 2048  ;;  %p528_p12 = scmp.lt.s32.totalorder %s41_s16, %s41_s16 }
  0x1b   :  { %p524_p11 = scmp.ne.s32.totalorder %s41_s16, %s523_s24  ;;  %p529_p13 = scmp.lt.s32.totalorder %s523_s24, %s523_s24 }
  0x1d   :  { %p530_p0 = por %p529_p13, %p528_p12 }
  0x1f   :  { %p531_p1 = pnand %p530_p0, %p524_p11 }
  0x21   :  { %534 = shalt.err (!%p531_p1)
}
  0x22   :  { %46 = dma.hbm_to_vmem [thread:$0]  %s685_s5, 2048, %s41_s16, [#allocation6], %s564_s11, %s564_s11, %s565_s12  }
  0x23   :  { %557 = dma.done.wait [#allocation3], 2048  }
  0x24   :  { %558 = vsyncadd [#allocation3], 4294965248 }
  0x25   :  { %559 = dma.done.wait [#allocation6], 2048  }
  0x26   :  { %560 = vsyncadd [#allocation6], 4294965248  ;;  %v567_v0 = vmov 0   ;;  %v55_v1 = vld [vmem:[%s680_s0] sm:$0xff]  ;;  %v568_v2 = vmov 1   ;;  %v100_v4 = vld [vmem:[#allocation2 + $0x8] sm:$0xff]  ;;  %v63_v29 = vlaneseq }
  0x27   :  { %481 = vset.pattern.permute.xlu0 %v567_v0  ;;  %v99_v3 = vld [vmem:[#allocation2] sm:$0xff]  ;;  %v569_v6 = vmov 0.0|0.0   ;;  %v101_v7 = vld [vmem:[#allocation2 + $0x10] sm:$0xff]  ;;  %v102_v8 = vld [vmem:[#allocation2 + $0x18] sm:$0xff]  ;;  %vm570_vm0 = vmmov 0   ;;  %v571_v13 = vmov 0.0  }
  0x28   :  { %60 = vperm.xlu0 %481, %v55_v1   ;;  %v424_v5 = vpack.c.bf16 %v100_v4, %v99_v3  ;;  %423 = vmatprep.subr.bf16.mxu0 %v569_v6  ;;  %v427_v9 = vpack.c.bf16 %v102_v8, %v101_v7  ;;  %v103_v10 = vld [vmem:[#allocation2 + $0x20] sm:$0xff]  ;;  %v104_v11 = vld [vmem:[#allocation2 + $0x28] sm:$0xff]  ;;  %v105_v14 = vld [vmem:[#allocation2 + $0x30] sm:$0xff]  ;;  %v64_v30 = vshrl.u32 %v63_v29, 7  ;;  %s572_s8 = smov [#allocation7]  }
  0x29   :  { %447 = vmatprep.subr.bf16.mxu1 %v569_v6  ;;  %v430_v12 = vpack.c.bf16 %v104_v11, %v103_v10  ;;  %385 = vmatprep.mubr.msk.f32.mxu0 %vm570_vm0, %v571_v13  ;;  %v106_v15 = vld [vmem:[#allocation2 + $0x38] sm:$0xff]  ;;  %v107_v17 = vld [vmem:[#allocation2 + $0x40] sm:$0xff]  ;;  %v108_v18 = vld [vmem:[#allocation2 + $0x48] sm:$0xff]  ;;  %s306_s9 = sshll.u32 %s572_s8, 4  ;;  %s307_s9 = int_to_ptr.vmem [resolvable:$true] %s306_s9 }
  0x2a   :  { %425 = vmatpush3.bf16.msra.mxu0 %v424_v5  ;;  %420 = vmatprep.mubr.msk.f32.mxu1 %vm570_vm0, %v571_v13  ;;  %v433_v16 = vpack.c.bf16 %v106_v15, %v105_v14  ;;  %v436_v19 = vpack.c.bf16 %v108_v18, %v107_v17  ;;  %v109_v20 = vld [vmem:[#allocation2 + $0x50] sm:$0xff]  ;;  %v110_v21 = vld [vmem:[#allocation2 + $0x58] sm:$0xff]  ;;  %v111_v23 = vld [vmem:[#allocation2 + $0x60] sm:$0xff]  ;;  %v65_v31 = vsub.s32 0, %v64_v30  ;;  %v81_v34 = vsub.s32 1, %v64_v30  ;;  %s535_s10 = scalar_lea.vmem %s307_s9, 128  ;;  %p540_p3 = scmp.lt.s32.totalorder %s307_s9, %s307_s9 }
  0x2b   :  { %426 = vmatprep.subr.bf16.mxu0 %v569_v6  ;;  %v439_v22 = vpack.c.bf16 %v110_v21, %v109_v20  ;;  %v112_v24 = vld [vmem:[#allocation2 + $0x68] sm:$0xff]  ;;  %v113_v26 = vld [vmem:[#allocation2 + $0x70] sm:$0xff]  ;;  %v114_v27 = vld [vmem:[#allocation2 + $0x78] sm:$0xff]  ;;  %p536_p2 = scmp.ne.s32.totalorder %s307_s9, %s535_s10  ;;  %p541_p4 = scmp.lt.s32.totalorder %s535_s10, %s535_s10 }
  0x2c   :  { %482 = vset.pattern.permute.xlu0 %v568_v2  ;;  %v442_v25 = vpack.c.bf16 %v112_v24, %v111_v23  ;;  %v445_v28 = vpack.c.bf16 %v114_v27, %v113_v26  ;;  %v56_v32 = vld [vmem:[%s681_s1] sm:$0x3]  ;;  %v207_v56 = vld [vmem:[#allocation5 + $0x8] sm:$0xff]  ;;  %v208_v58 = vld [vmem:[#allocation5 + $0x10] sm:$0xff] }
  0x2d   :  { %76 = vperm.xlu0 %482, %v55_v1   ;;  %v66_v33 = vrot.slane %v56_v32, %v65_v31  ;;  %v82_v37 = vrot.slane %v56_v32, %v81_v34  ;;  %v316_v38 = vld [vmem:[%s682_s2] ss:$0 sm:$0xff]  ;;  %v209_v59 = vld [vmem:[#allocation5 + $0x18] sm:$0xff]  ;;  %v211_v62 = vld [vmem:[#allocation5 + $0x28] sm:$0xff]  ;;  %p542_p5 = por %p541_p4, %p540_p3 }
  0x2e   :  { %428 = vmatpush3.bf16.msra.mxu0 %v427_v9  ;;  %v206_v55 = vld [vmem:[#allocation5] sm:$0xff]  ;;  %v451_v60 = vpack.c.bf16 %v209_v59, %v208_v58  ;;  %v212_v0 = vld [vmem:[#allocation5 + $0x30] sm:$0xff]  ;;  %v213_v1 = vld [vmem:[#allocation5 + $0x38] sm:$0xff] }
  0x2f   :  { %429 = vmatprep.subr.bf16.mxu0 %v569_v6  ;;  %v448_v57 = vpack.c.bf16 %v207_v56, %v206_v55  ;;  %v210_v61 = vld [vmem:[#allocation5 + $0x20] sm:$0xff]  ;;  %v457_v2 = vpack.c.bf16 %v213_v1, %v212_v0  ;;  %v215_v4 = vld [vmem:[#allocation5 + $0x48] sm:$0xff]  ;;  %v216_v7 = vld [vmem:[#allocation5 + $0x50] sm:$0xff]  ;;  %p543_p6 = pnand %p542_p5, %p536_p2 }
  0x30   :  { %v454_v63 = vpack.c.bf16 %v211_v62, %v210_v61  ;;  %v214_v3 = vld [vmem:[#allocation5 + $0x40] sm:$0xff]  ;;  %v217_v8 = vld [vmem:[#allocation5 + $0x58] sm:$0xff]  ;;  %v219_v11 = vld [vmem:[#allocation5 + $0x68] sm:$0xff] }
  0x31   :  { %449 = vmatpush3.bf16.msra.mxu1 %v448_v57  ;;  %v460_v5 = vpack.c.bf16 %v215_v4, %v214_v3  ;;  %v463_v9 = vpack.c.bf16 %v217_v8, %v216_v7  ;;  %v218_v10 = vld [vmem:[#allocation5 + $0x60] sm:$0xff]  ;;  %v220_v13 = vld [vmem:[#allocation5 + $0x70] sm:$0xff]  ;;  %v221_v14 = vld [vmem:[#allocation5 + $0x78] sm:$0xff] }
  0x32   :  { %431 = vmatpush3.bf16.msra.mxu0 %v430_v12  ;;  %450 = vmatprep.subr.bf16.mxu1 %v569_v6  ;;  %v466_v12 = vpack.c.bf16 %v219_v11, %v218_v10  ;;  %v469_v15 = vpack.c.bf16 %v221_v14, %v220_v13  ;;  %v318_v31 = vld [vmem:[%s686_s6] ss:$0 sm:$0xff] }
  0x33   :  { %432 = vmatprep.subr.bf16.mxu0 %v569_v6 }
  0x35   :  { %452 = vmatpush3.bf16.msra.mxu1 %v451_v60 }
  0x36   :  { %434 = vmatpush3.bf16.msra.mxu0 %v433_v16  ;;  %453 = vmatprep.subr.bf16.mxu1 %v569_v6  ;;  %v317_v16 = vld [vmem:[%s684_s4] ss:$0 sm:$0xff] }
  0x37   :  { %435 = vmatprep.subr.bf16.mxu0 %v569_v6 }
  0x39   :  { %455 = vmatpush3.bf16.msra.mxu1 %v454_v63 }
  0x3a   :  { %437 = vmatpush3.bf16.msra.mxu0 %v436_v19  ;;  %456 = vmatprep.subr.bf16.mxu1 %v569_v6 }
  0x3b   :  { %438 = vmatprep.subr.bf16.mxu0 %v569_v6 }
  0x3d   :  { %458 = vmatpush3.bf16.msra.mxu1 %v457_v2 }
  0x3e   :  { %440 = vmatpush3.bf16.msra.mxu0 %v439_v22  ;;  %459 = vmatprep.subr.bf16.mxu1 %v569_v6 }
  0x3f   :  { %441 = vmatprep.subr.bf16.mxu0 %v569_v6 }
  0x41   :  { %461 = vmatpush3.bf16.msra.mxu1 %v460_v5 }
  0x42   :  { %443 = vmatpush3.bf16.msra.mxu0 %v442_v25  ;;  %462 = vmatprep.subr.bf16.mxu1 %v569_v6 }
  0x43   :  { %444 = vmatprep.subr.bf16.mxu0 %v569_v6 }
  0x45   :  { %464 = vmatpush3.bf16.msra.mxu1 %v463_v9 }
  0x46   :  { %446 = vmatpush3.bf16.msra.mxu0 %v445_v28  ;;  %465 = vmatprep.subr.bf16.mxu1 %v569_v6 }
  0x49   :  { %467 = vmatpush3.bf16.msra.mxu1 %v466_v12 }
  0x4a   :  { %468 = vmatprep.subr.bf16.mxu1 %v569_v6 }
  0x4d   :  { %470 = vmatpush3.bf16.msra.mxu1 %v469_v15 }
  0xa7   :  { %v61_v35 = vpop.permute.xlu0 %60 }
  0xa8   :  { %v67_v36 = vmul.f32 %v66_v33, %v61_v35 }
  0xaa   :  { %v74_v40 = vadd.f32 %v316_v38, %v67_v36 }
  0xac   :  { %v77_v39 = vpop.permute.xlu0 %76 }
  0xad   :  { %v83_v41 = vmul.f32 %v82_v37, %v77_v39 }
  0xaf   :  { %v84_v42 = vadd.f32 %v83_v41, %v74_v40 }
  0xb1   :  { %v86_v43 = vmin.f32 %v84_v42, 20.0  ;;  %vm85_vm2 = vcmp.gt.f32.partialorder %v84_v42, 20.0 }
  0xb3   :  { %v87_v44 = vmul.f32 1.442695, %v86_v43 }
  0xb5   :  { %483 = vpow2.f32 %v87_v44 }
  0xbf   :  { %v484_v45 = vpop.eup %483 }
  0xc0   :  { %v89_v46 = vadd.f32 1.0, %v484_v45  ;;  %v92_v47 = vmul.f32 -0.5, %v484_v45  ;;  %v95_v49 = vand.u32 2147483647, %v484_v45 }
  0xc2   :  { %485 = vlog2.f32 %v89_v46  ;;  %v93_v48 = vadd.f32 1.0, %v92_v47  ;;  %vm96_vm1 = vcmp.lt.f32.partialorder %v95_v49, 0.0004427343 }
  0xc4   :  { %v94_v52 = vmul.f32 %v484_v45, %v93_v48 }
  0xcc   :  { %v486_v50 = vpop.eup %485 }
  0xcd   :  { %v91_v51 = vmul.f32 0.6931472, %v486_v50 }
  0xcf   :  { %v97_v53 = vsel %vm96_vm1, %v94_v52, %v91_v51 }
  0xd0   :  { %v98_v54 = vsel %vm85_vm2, %v84_v42, %v97_v53 }
  0xd1   :  { %386 = vmatmul.mubr.f32.vlgmr.msra.gmra.mrb[0].mxu0 %v98_v54 }
 0x1a4   :  { %v188_v17 = vpop.f32.mrb[0].mxu0 }
 0x1a5   :  { %v189_v18 = vadd.f32 %v317_v16, %v188_v17  ;;  %v387_v19 = vpop.f32.mrb[1].mxu0 }
 0x1a7   :  { %v193_v20 = vmin.f32 %v189_v18, 20.0  ;;  %vm192_vm4 = vcmp.gt.f32.partialorder %v189_v18, 20.0 }
 0x1a9   :  { %v194_v21 = vmul.f32 1.442695, %v193_v20 }
 0x1ab   :  { %487 = vpow2.f32 %v194_v21 }
 0x1b5   :  { %v488_v22 = vpop.eup %487 }
 0x1b6   :  { %v196_v23 = vadd.f32 1.0, %v488_v22  ;;  %v199_v24 = vmul.f32 -0.5, %v488_v22  ;;  %v202_v26 = vand.u32 2147483647, %v488_v22 }
 0x1b8   :  { %489 = vlog2.f32 %v196_v23  ;;  %v200_v25 = vadd.f32 1.0, %v199_v24  ;;  %vm203_vm3 = vcmp.lt.f32.partialorder %v202_v26, 0.0004427343 }
 0x1ba   :  { %v201_v6 = vmul.f32 %v488_v22, %v200_v25 }
 0x1c2   :  { %v490_v27 = vpop.eup %489 }
 0x1c3   :  { %v198_v28 = vmul.f32 0.6931472, %v490_v27 }
 0x1c5   :  { %v204_v29 = vsel %vm203_vm3, %v201_v6, %v198_v28 }
 0x1c6   :  { %v205_v30 = vsel %vm192_vm4, %v189_v18, %v204_v29 }
 0x1c7   :  { %421 = vmatmul.mubr.f32.vlgmr.msra.gmra.mrb[0].mxu1 %v205_v30 }
 0x29a   :  { %v295_v32 = vpop.f32.mrb[0].mxu1 }
 0x29b   :  { %v296_v33 = vadd.f32 %v318_v31, %v295_v32  ;;  %v422_v34 = vpop.f32.mrb[1].mxu1 }
 0x29d   :  { %299 = vst [vmem:[#allocation7] sm:$0xff] %v296_v33 }
 0x29e   :  { %546 = shalt.err (!%p543_p6)
}
 0x29f   :  { %s547_s13 = scalar_lea.hbm %s687_s7, 128 }
 0x2a0   :  { %p548_p7 = scmp.ne.s32.totalorder %s687_s7, %s547_s13  ;;  %p551_p8 = scmp.lt.u32.totalorder %s547_s13, %s687_s7 }
 0x2a2   :  { %p553_p9 = pnand %p551_p8, %p548_p7 }
 0x2a4   :  { %556 = shalt.err (!%p553_p9)
}
 0x2a5   :  { %309 = dma.vmem_to_hbm [thread:$0]  %s307_s9, 128, %s687_s7, [#allocation4]  }
 0x2a6   :  { %561 = dma.done.wait [#allocation4], 128  }
 0x2a7   :  { %562 = vsyncadd [#allocation4], 4294967168 }
 0x2a8   :  { %313 = vsyncpa [#allocation3], 1 }
 0x2a9   :  { %314 = vsyncpa [#allocation6], 1 }
 0x2aa   :  { %315 = vsyncpa [#allocation4], 1 }

</bundles_post_ra>
